<compile_context>
chip_gen: v7x
topology: tpu7x:2x2x1
jax: 0.10.0
libtpu: 0.0.40
codegen_flags: <defaults>
</compile_context>

<pallas_src>
import functools
import math

import jax
import jax.numpy as jnp
from jax.experimental import pallas as pl
from jax.experimental.pallas import tpu as pltpu


# ----------------------------------------------------------------------------
# Kernel 1: c_attn projection -> lane-dense q (pre-scaled), k, v slabs.
# ----------------------------------------------------------------------------
def _c_attn_kernel(x_ref, wv_ref, wq_ref, wk_ref, bv_ref, bq_ref, bk_ref,
                   q_ref, k_ref, v_ref, *, q_scale):
    x = x_ref[0]                                             # (t_seq, D)
    v = jnp.dot(x, wv_ref[...], preferred_element_type=jnp.float32) + bv_ref[0]
    q = jnp.dot(x, wq_ref[...], preferred_element_type=jnp.float32) + bq_ref[0]
    k = jnp.dot(x, wk_ref[...], preferred_element_type=jnp.float32) + bk_ref[0]
    q_ref[0] = (q * q_scale).astype(q_ref.dtype)             # 1/sqrt(k_d) once
    k_ref[0] = k.astype(k_ref.dtype)
    v_ref[0] = v.astype(v_ref.dtype)


# ----------------------------------------------------------------------------
# Kernel 2: flash-style causal attention (heads batched) + fused c_proj.
# ----------------------------------------------------------------------------
def _attention_proj_kernel(q_ref, k_ref, v_ref, wp_ref, bp_ref, o_ref,
                           m_sc, l_sc, acc_sc, *, t_q, t_k):
    qi = pl.program_id(1)
    ki = pl.program_id(2)
    nk = pl.num_programs(2)

    q_start = qi * t_q
    k_start = ki * t_k

    @pl.when(ki == 0)
    def _init():
        m_sc[...] = jnp.full_like(m_sc, -jnp.inf)
        l_sc[...] = jnp.zeros_like(l_sc)
        acc_sc[...] = jnp.zeros_like(acc_sc)

    # Skip kv tiles that lie entirely above the causal diagonal.
    @pl.when(k_start <= q_start + t_q - 1)
    def _update():
        q = q_ref[0].astype(jnp.float32)                     # (H, t_q, kd), pre-scaled
        k = k_ref[0]                                         # (H, t_k, kd)
        v = v_ref[0]                                         # (H, t_k, kd)

        # scores: contract the last (k_d) dims directly, batched over heads.
        s = jax.lax.dot_general(
            q, k, (((2,), (2,)), ((0,), (0,))),
            preferred_element_type=jnp.float32)              # (H, t_q, t_k)

        row = q_start + jax.lax.broadcasted_iota(jnp.int32, (t_q, t_k), 0)
        col = k_start + jax.lax.broadcasted_iota(jnp.int32, (t_q, t_k), 1)
        mask = row >= col                                    # causal (tril)
        # b in {0,1}  =>  s*b - 1e10*(1-b) == where(b, s, -1e10)
        s = jnp.where(mask[None, :, :], s, -1.0e10)

        m_prev = m_sc[...]                                   # (H, t_q, 1)
        m_new = jnp.maximum(m_prev, jnp.max(s, axis=-1, keepdims=True))
        alpha = jnp.exp(m_prev - m_new)
        p = jnp.exp(s - m_new)                               # (H, t_q, t_k)

        l_sc[...] = alpha * l_sc[...] + jnp.sum(p, axis=-1, keepdims=True)
        acc_sc[...] = alpha * acc_sc[...] + jax.lax.dot_general(
            p.astype(v.dtype), v, (((2,), (1,)), ((0,), (0,))),
            preferred_element_type=jnp.float32)              # (H, t_q, kd)
        m_sc[...] = m_new

    @pl.when(ki == nk - 1)
    def _epilogue():
        inv_l = pl.reciprocal(l_sc[...], approx=True)        # EUP slot
        o = acc_sc[...] * inv_l                              # (H, t_q, kd)
        # c_proj without a head-merge relayout:
        #   merged @ W_proj == sum_h o[h] @ W_proj[h*kd:(h+1)*kd, :]
        per_head = jax.lax.dot_general(
            o.astype(wp_ref.dtype), wp_ref[...],
            (((2,), (1,)), ((0,), (0,))),
            preferred_element_type=jnp.float32)              # (H, t_q, D)
        out = jnp.sum(per_head, axis=0) + bp_ref[0]          # (t_q, D)
        o_ref[0] = out.astype(o_ref.dtype)


# ----------------------------------------------------------------------------
# Wrapper
# ----------------------------------------------------------------------------
def multi_head_attention(x, w_qkv, b_qkv, w_proj, b_proj, *, head,
                         seq_tile=128, q_tile=128, kv_tile=128):
    """x: [B, T, D]; w_qkv: [D, 3D]; b_qkv: [3D]; w_proj: [D, D]; b_proj: [D].

    Returns (out [B, T, D], present [2, B, H, T, k_d]).
    Equivalent to the PyTorch module's forward with layer_past=None.
    """
    B, T, D = x.shape
    assert D % head == 0, "d_model must be divisible by head"
    kd = D // head

    t_seq = min(T, seq_tile)
    t_q = min(T, q_tile)
    t_k = min(T, kv_tile)
    assert T % t_seq == 0 and T % t_q == 0 and T % t_k == 0

    vmem_params = dict(vmem_limit_bytes=48 * 1024 * 1024)   # fits v7x 64 MiB

    # torch splits c_attn output columns in (value, query, key) order.
    w_v, w_q, w_k = w_qkv[:, :D], w_qkv[:, D:2 * D], w_qkv[:, 2 * D:]
    b_v = b_qkv[:D].reshape(1, D)
    b_q = b_qkv[D:2 * D].reshape(1, D)
    b_k = b_qkv[2 * D:].reshape(1, D)

    # --- kernel 1: c_attn -> lane-dense (B, T, D) q / k / v -----------------
    c_attn_kernel = functools.partial(_c_attn_kernel,
                                      q_scale=1.0 / math.sqrt(float(kd)))
    qkv_shapes = tuple(jax.ShapeDtypeStruct((B, T, D), x.dtype) for _ in range(3))
    q, k, v = pl.pallas_call(
        c_attn_kernel,
        out_shape=qkv_shapes,
        grid=(B, T // t_seq),
        in_specs=[
            pl.BlockSpec((1, t_seq, D), lambda b, ti: (b, ti, 0)),   # x
            pl.BlockSpec((D, D), lambda b, ti: (0, 0)),              # w_v
            pl.BlockSpec((D, D), lambda b, ti: (0, 0)),              # w_q
            pl.BlockSpec((D, D), lambda b, ti: (0, 0)),              # w_k
            pl.BlockSpec((1, D), lambda b, ti: (0, 0)),              # b_v
            pl.BlockSpec((1, D), lambda b, ti: (0, 0)),              # b_q
            pl.BlockSpec((1, D), lambda b, ti: (0, 0)),              # b_k
        ],
        out_specs=[
            pl.BlockSpec((1, t_seq, D), lambda b, ti: (b, ti, 0)),
            pl.BlockSpec((1, t_seq, D), lambda b, ti: (b, ti, 0)),
            pl.BlockSpec((1, t_seq, D), lambda b, ti: (b, ti, 0)),
        ],
        compiler_params=pltpu.CompilerParams(
            dimension_semantics=("parallel", "parallel"), **vmem_params),
    )(x, w_v, w_q, w_k, b_v, b_q, b_k)

    # Head split + `present` layout done in the wrapper (lane-dense kernel
    # stores; XLA handles the HBM transpose, which is needed for `present`
    # anyway).
    def split_heads(t):
        return jnp.transpose(t.reshape(B, T, head, kd), (0, 2, 1, 3))

    q_h, k_h, v_h = split_heads(q), split_heads(k), split_heads(v)
    present = jnp.stack((k_h, v_h))                          # (2, B, H, T, kd)

    w_proj_h = w_proj.reshape(head, kd, D)
    b_proj2 = b_proj.reshape(1, D)

    # --- kernel 2: flash attention + c_proj ---------------------------------
    attn_kernel = functools.partial(_attention_proj_kernel, t_q=t_q, t_k=t_k)
    out = pl.pallas_call(
        attn_kernel,
        out_shape=jax.ShapeDtypeStruct((B, T, D), x.dtype),
        grid=(B, T // t_q, T // t_k),
        in_specs=[
            pl.BlockSpec((1, head, t_q, kd), lambda b, qi, ki: (b, 0, qi, 0)),
            pl.BlockSpec((1, head, t_k, kd), lambda b, qi, ki: (b, 0, ki, 0)),
            pl.BlockSpec((1, head, t_k, kd), lambda b, qi, ki: (b, 0, ki, 0)),
            pl.BlockSpec((head, kd, D), lambda b, qi, ki: (0, 0, 0)),  # w_proj
            pl.BlockSpec((1, D), lambda b, qi, ki: (0, 0)),            # b_proj
        ],
        out_specs=pl.BlockSpec((1, t_q, D), lambda b, qi, ki: (b, qi, 0)),
        scratch_shapes=[
            pltpu.VMEM((head, t_q, 1), jnp.float32),    # running max
            pltpu.VMEM((head, t_q, 1), jnp.float32),    # running denom
            pltpu.VMEM((head, t_q, kd), jnp.float32),   # output accumulator
        ],
        compiler_params=pltpu.CompilerParams(
            dimension_semantics=("parallel", "parallel", "arbitrary"),
            **vmem_params),
    )(q_h, k_h, v_h, w_proj_h, b_proj2)

    return out, present


# ----------------------------------------------------------------------------
# Pure-JAX reference mirroring the PyTorch module exactly.
# ----------------------------------------------------------------------------
def _reference(x, w_qkv, b_qkv, w_proj, b_proj, *, head):
    B, T, D = x.shape
    kd = D // head
    qkv = x @ w_qkv + b_qkv
    value, query, key = (qkv[..., :D], qkv[..., D:2 * D], qkv[..., 2 * D:])

    def split(t):
        return t.reshape(B, T, head, kd).transpose(0, 2, 1, 3)

    value, query, key = split(value), split(query), split(key)
    present = jnp.stack((key, value))

    s = jnp.einsum("bhqd,bhkd->bhqk", query, key) / math.sqrt(float(kd))
    b = jnp.tril(jnp.ones((T, T), x.dtype))[None, None]
    s = s * b - 1.0e10 * (1.0 - b)
    s = jax.nn.softmax(s, axis=-1)
    o = jnp.einsum("bhqk,bhkd->bhqd", s, value)
    o = o.transpose(0, 2, 1, 3).reshape(B, T, D)
    o = o @ w_proj + b_proj
    return o, present


if __name__ == "__main__":
    B, T, D, H = 2, 8, 32, 4

    key = jax.random.PRNGKey(0)
    k1, k2, k3, k4, k5 = jax.random.split(key, 5)
    x = jax.random.normal(k1, (B, T, D), dtype=jnp.float32)
    w_qkv = jax.random.normal(k2, (D, 3 * D), dtype=jnp.float32) * 0.02
    b_qkv = jax.random.normal(k3, (3 * D,), dtype=jnp.float32) * 0.02
    w_proj = jax.random.normal(k4, (D, D), dtype=jnp.float32) * 0.02
    b_proj = jax.random.normal(k5, (D,), dtype=jnp.float32) * 0.02

    mha = jax.jit(functools.partial(multi_head_attention, head=H))
    out, present = mha(x, w_qkv, b_qkv, w_proj, b_proj)
    jax.block_until_ready((out, present))

    ref_out, ref_present = _reference(x, w_qkv, b_qkv, w_proj, b_proj, head=H)
    assert out.shape == (B, T, D)
    assert present.shape == (2, B, H, T, D // H)
    assert jnp.allclose(out, ref_out, rtol=1e-3, atol=1e-3)
    assert jnp.allclose(present, ref_present, rtol=1e-4, atol=1e-4)

    print("KERNEL_OK")
</pallas_src>

<mosaic_0001>
module attributes {stable_mosaic.version = 11 : i64} {
  func.func @_c_attn_kernel(%arg0: i32, %arg1: i32, %arg2: memref<1x8x32xf32, #tpu.memory_space<vmem>>, %arg3: memref<32x32xf32, #tpu.memory_space<vmem>>, %arg4: memref<32x32xf32, #tpu.memory_space<vmem>>, %arg5: memref<32x32xf32, #tpu.memory_space<vmem>>, %arg6: memref<1x32xf32, #tpu.memory_space<vmem>>, %arg7: memref<1x32xf32, #tpu.memory_space<vmem>>, %arg8: memref<1x32xf32, #tpu.memory_space<vmem>>, %arg9: memref<1x8x32xf32, #tpu.memory_space<vmem>>, %arg10: memref<1x8x32xf32, #tpu.memory_space<vmem>>, %arg11: memref<1x8x32xf32, #tpu.memory_space<vmem>>) attributes {dimension_semantics = [#tpu.dimension_semantics<parallel>, #tpu.dimension_semantics<parallel>], iteration_bounds = array<i64: 2, 1>, scalar_prefetch = 0 : i64, scratch_operands = 0 : i64, tpu.core_type = #tpu.core_type<tc>, window_params = [{transform_indices = @transform_0, window_bounds = array<i64: 1, 8, 32>}, {pipeline_mode = #tpu.pipeline_mode<synchronous>, transform_indices = @transform_1, window_bounds = array<i64: 32, 32>}, {pipeline_mode = #tpu.pipeline_mode<synchronous>, transform_indices = @transform_2, window_bounds = array<i64: 32, 32>}, {pipeline_mode = #tpu.pipeline_mode<synchronous>, transform_indices = @transform_3, window_bounds = array<i64: 32, 32>}, {pipeline_mode = #tpu.pipeline_mode<synchronous>, transform_indices = @transform_4, window_bounds = array<i64: 1, 32>}, {pipeline_mode = #tpu.pipeline_mode<synchronous>, transform_indices = @transform_5, window_bounds = array<i64: 1, 32>}, {pipeline_mode = #tpu.pipeline_mode<synchronous>, transform_indices = @transform_6, window_bounds = array<i64: 1, 32>}, {transform_indices = @transform_7, window_bounds = array<i64: 1, 8, 32>}, {transform_indices = @transform_8, window_bounds = array<i64: 1, 8, 32>}, {transform_indices = @transform_9, window_bounds = array<i64: 1, 8, 32>}]} {
    %c0 = arith.constant 0 : index
    %c0_0 = arith.constant 0 : index
    %c0_1 = arith.constant 0 : index
    %0 = vector.load %arg2[%c0, %c0_0, %c0_1] : memref<1x8x32xf32, #tpu.memory_space<vmem>>, vector<1x8x32xf32>
    %1 = vector.shape_cast %0 : vector<1x8x32xf32> to vector<8x32xf32>
    %c0_2 = arith.constant 0 : index
    %c0_3 = arith.constant 0 : index
    %2 = vector.load %arg3[%c0_2, %c0_3] : memref<32x32xf32, #tpu.memory_space<vmem>>, vector<32x32xf32>
    %cst = arith.constant dense<0.000000e+00> : vector<8x32xf32>
    %3 = tpu.matmul %1, %2, %cst {dimension_numbers = #tpu.dot_dimension_numbers<[1], [0], [0], [1], [0, 0, 1, 1], [], []>} : vector<8x32xf32>, vector<32x32xf32>, vector<8x32xf32> -> vector<8x32xf32>
    %c0_4 = arith.constant 0 : index
    %c0_5 = arith.constant 0 : index
    %4 = vector.load %arg6[%c0_4, %c0_5] : memref<1x32xf32, #tpu.memory_space<vmem>>, vector<1x32xf32>
    %5 = vector.shape_cast %4 : vector<1x32xf32> to vector<32xf32>
    %6 = vector.shape_cast %5 : vector<32xf32> to vector<1x32xf32>
    %7 = vector.broadcast %6 : vector<1x32xf32> to vector<8x32xf32>
    %8 = arith.addf %3, %7 : vector<8x32xf32>
    %c0_6 = arith.constant 0 : index
    %c0_7 = arith.constant 0 : index
    %9 = vector.load %arg4[%c0_6, %c0_7] : memref<32x32xf32, #tpu.memory_space<vmem>>, vector<32x32xf32>
    %cst_8 = arith.constant dense<0.000000e+00> : vector<8x32xf32>
    %10 = tpu.matmul %1, %9, %cst_8 {dimension_numbers = #tpu.dot_dimension_numbers<[1], [0], [0], [1], [0, 0, 1, 1], [], []>} : vector<8x32xf32>, vector<32x32xf32>, vector<8x32xf32> -> vector<8x32xf32>
    %c0_9 = arith.constant 0 : index
    %c0_10 = arith.constant 0 : index
    %11 = vector.load %arg7[%c0_9, %c0_10] : memref<1x32xf32, #tpu.memory_space<vmem>>, vector<1x32xf32>
    %12 = vector.shape_cast %11 : vector<1x32xf32> to vector<32xf32>
    %13 = vector.shape_cast %12 : vector<32xf32> to vector<1x32xf32>
    %14 = vector.broadcast %13 : vector<1x32xf32> to vector<8x32xf32>
    %15 = arith.addf %10, %14 : vector<8x32xf32>
    %c0_11 = arith.constant 0 : index
    %c0_12 = arith.constant 0 : index
    %16 = vector.load %arg5[%c0_11, %c0_12] : memref<32x32xf32, #tpu.memory_space<vmem>>, vector<32x32xf32>
    %cst_13 = arith.constant dense<0.000000e+00> : vector<8x32xf32>
    %17 = tpu.matmul %1, %16, %cst_13 {dimension_numbers = #tpu.dot_dimension_numbers<[1], [0], [0], [1], [0, 0, 1, 1], [], []>} : vector<8x32xf32>, vector<32x32xf32>, vector<8x32xf32> -> vector<8x32xf32>
    %c0_14 = arith.constant 0 : index
    %c0_15 = arith.constant 0 : index
    %18 = vector.load %arg8[%c0_14, %c0_15] : memref<1x32xf32, #tpu.memory_space<vmem>>, vector<1x32xf32>
    %19 = vector.shape_cast %18 : vector<1x32xf32> to vector<32xf32>
    %20 = vector.shape_cast %19 : vector<32xf32> to vector<1x32xf32>
    %21 = vector.broadcast %20 : vector<1x32xf32> to vector<8x32xf32>
    %22 = arith.addf %17, %21 : vector<8x32xf32>
    %cst_16 = arith.constant 0.353553385 : f32
    %23 = vector.broadcast %cst_16 : f32 to vector<8x32xf32>
    %24 = arith.mulf %15, %23 : vector<8x32xf32>
    %c0_17 = arith.constant 0 : index
    %c0_18 = arith.constant 0 : index
    %c0_19 = arith.constant 0 : index
    %25 = vector.load %arg9[%c0_17, %c0_18, %c0_19] : memref<1x8x32xf32, #tpu.memory_space<vmem>>, vector<1x8x32xf32>
    %26 = vector.shape_cast %25 : vector<1x8x32xf32> to vector<8x32xf32>
    %27 = vector.shape_cast %24 : vector<8x32xf32> to vector<1x8x32xf32>
    tpu.vector_store %arg9[%c0_17, %c0_18, %c0_19], %27 {strides = array<i32>} : memref<1x8x32xf32, #tpu.memory_space<vmem>>, vector<1x8x32xf32>,
    %c0_20 = arith.constant 0 : index
    %c0_21 = arith.constant 0 : index
    %c0_22 = arith.constant 0 : index
    %28 = vector.load %arg10[%c0_20, %c0_21, %c0_22] : memref<1x8x32xf32, #tpu.memory_space<vmem>>, vector<1x8x32xf32>
    %29 = vector.shape_cast %28 : vector<1x8x32xf32> to vector<8x32xf32>
    %30 = vector.shape_cast %22 : vector<8x32xf32> to vector<1x8x32xf32>
    tpu.vector_store %arg10[%c0_20, %c0_21, %c0_22], %30 {strides = array<i32>} : memref<1x8x32xf32, #tpu.memory_space<vmem>>, vector<1x8x32xf32>,
    %c0_23 = arith.constant 0 : index
    %c0_24 = arith.constant 0 : index
    %c0_25 = arith.constant 0 : index
    %31 = vector.load %arg11[%c0_23, %c0_24, %c0_25] : memref<1x8x32xf32, #tpu.memory_space<vmem>>, vector<1x8x32xf32>
    %32 = vector.shape_cast %31 : vector<1x8x32xf32> to vector<8x32xf32>
    %33 = vector.shape_cast %8 : vector<8x32xf32> to vector<1x8x32xf32>
    tpu.vector_store %arg11[%c0_23, %c0_24, %c0_25], %33 {strides = array<i32>} : memref<1x8x32xf32, #tpu.memory_space<vmem>>, vector<1x8x32xf32>,
    return
  }
  func.func @transform_0(%arg0: i32, %arg1: i32) -> (i32, i32, i32) {
    %c0_i32 = arith.constant 0 : i32
    %c0_i32_0 = arith.constant 0 : i32
    return %arg0, %arg1, %c0_i32 : i32, i32, i32
  }
  func.func @transform_1(%arg0: i32, %arg1: i32) -> (i32, i32) {
    %c0_i32 = arith.constant 0 : i32
    %c0_i32_0 = arith.constant 0 : i32
    %c0_i32_1 = arith.constant 0 : i32
    return %c0_i32, %c0_i32_0 : i32, i32
  }
  func.func @transform_2(%arg0: i32, %arg1: i32) -> (i32, i32) {
    %c0_i32 = arith.constant 0 : i32
    %c0_i32_0 = arith.constant 0 : i32
    %c0_i32_1 = arith.constant 0 : i32
    return %c0_i32, %c0_i32_0 : i32, i32
  }
  func.func @transform_3(%arg0: i32, %arg1: i32) -> (i32, i32) {
    %c0_i32 = arith.constant 0 : i32
    %c0_i32_0 = arith.constant 0 : i32
    %c0_i32_1 = arith.constant 0 : i32
    return %c0_i32, %c0_i32_0 : i32, i32
  }
  func.func @transform_4(%arg0: i32, %arg1: i32) -> (i32, i32) {
    %c0_i32 = arith.constant 0 : i32
    %c0_i32_0 = arith.constant 0 : i32
    %c0_i32_1 = arith.constant 0 : i32
    return %c0_i32, %c0_i32_0 : i32, i32
  }
  func.func @transform_5(%arg0: i32, %arg1: i32) -> (i32, i32) {
    %c0_i32 = arith.constant 0 : i32
    %c0_i32_0 = arith.constant 0 : i32
    %c0_i32_1 = arith.constant 0 : i32
    return %c0_i32, %c0_i32_0 : i32, i32
  }
  func.func @transform_6(%arg0: i32, %arg1: i32) -> (i32, i32) {
    %c0_i32 = arith.constant 0 : i32
    %c0_i32_0 = arith.constant 0 : i32
    %c0_i32_1 = arith.constant 0 : i32
    return %c0_i32, %c0_i32_0 : i32, i32
  }
  func.func @transform_7(%arg0: i32, %arg1: i32) -> (i32, i32, i32) {
    %c0_i32 = arith.constant 0 : i32
    %c0_i32_0 = arith.constant 0 : i32
    return %arg0, %arg1, %c0_i32 : i32, i32, i32
  }
  func.func @transform_8(%arg0: i32, %arg1: i32) -> (i32, i32, i32) {
    %c0_i32 = arith.constant 0 : i32
    %c0_i32_0 = arith.constant 0 : i32
    return %arg0, %arg1, %c0_i32 : i32, i32, i32
  }
  func.func @transform_9(%arg0: i32, %arg1: i32) -> (i32, i32, i32) {
    %c0_i32 = arith.constant 0 : i32
    %c0_i32_0 = arith.constant 0 : i32
    return %arg0, %arg1, %c0_i32 : i32, i32, i32
  }
}

module attributes {stable_mosaic.version = 11 : i64} {
  func.func @_attention_proj_kernel(%arg0: i32, %arg1: i32, %arg2: i32, %arg3: memref<1x4x8x8xf32, #tpu.memory_space<vmem>>, %arg4: memref<1x4x8x8xf32, #tpu.memory_space<vmem>>, %arg5: memref<1x4x8x8xf32, #tpu.memory_space<vmem>>, %arg6: memref<4x8x32xf32, #tpu.memory_space<vmem>>, %arg7: memref<1x32xf32, #tpu.memory_space<vmem>>, %arg8: memref<1x8x32xf32, #tpu.memory_space<vmem>>, %arg9: memref<4x8x1xf32, #tpu.memory_space<vmem>>, %arg10: memref<4x8x1xf32, #tpu.memory_space<vmem>>, %arg11: memref<4x8x8xf32, #tpu.memory_space<vmem>>) attributes {dimension_semantics = [#tpu.dimension_semantics<parallel>, #tpu.dimension_semantics<parallel>, #tpu.dimension_semantics<arbitrary>], iteration_bounds = array<i64: 2, 1, 1>, scalar_prefetch = 0 : i64, scratch_operands = 3 : i64, tpu.core_type = #tpu.core_type<tc>, window_params = [{transform_indices = @transform_0, window_bounds = array<i64: 1, 4, 8, 8>}, {transform_indices = @transform_1, window_bounds = array<i64: 1, 4, 8, 8>}, {transform_indices = @transform_2, window_bounds = array<i64: 1, 4, 8, 8>}, {pipeline_mode = #tpu.pipeline_mode<synchronous>, transform_indices = @transform_3, window_bounds = array<i64: 4, 8, 32>}, {pipeline_mode = #tpu.pipeline_mode<synchronous>, transform_indices = @transform_4, window_bounds = array<i64: 1, 32>}, {transform_indices = @transform_5, window_bounds = array<i64: 1, 8, 32>}]} {
    %c8_i32 = arith.constant 8 : i32
    %0 = arith.muli %arg1, %c8_i32 : i32
    %c8_i32_0 = arith.constant 8 : i32
    %1 = arith.muli %arg2, %c8_i32_0 : i32
    %c0_i32 = arith.constant 0 : i32
    %2 = arith.cmpi eq, %arg2, %c0_i32 : i32
    %3 = arith.extui %2 : i1 to i32
    %c0_i32_1 = arith.constant 0 : i32
    %4 = arith.cmpi ne, %3, %c0_i32_1 : i32
    scf.if %4 {
      %cst = arith.constant 0xFF800000 : f32
      %13 = vector.broadcast %cst : f32 to vector<4x8x1xf32>
      %c0 = arith.constant 0 : index
      %c0_6 = arith.constant 0 : index
      %c0_7 = arith.constant 0 : index
      %14 = vector.load %arg9[%c0, %c0_6, %c0_7] : memref<4x8x1xf32, #tpu.memory_space<vmem>>, vector<4x8x1xf32>
      tpu.vector_store %arg9[%c0, %c0_6, %c0_7], %13 {strides = array<i32>} : memref<4x8x1xf32, #tpu.memory_space<vmem>>, vector<4x8x1xf32>,
      %cst_8 = arith.constant 0.000000e+00 : f32
      %15 = vector.broadcast %cst_8 : f32 to vector<4x8x1xf32>
      %c0_9 = arith.constant 0 : index
      %c0_10 = arith.constant 0 : index
      %c0_11 = arith.constant 0 : index
      %16 = vector.load %arg10[%c0_9, %c0_10, %c0_11] : memref<4x8x1xf32, #tpu.memory_space<vmem>>, vector<4x8x1xf32>
      tpu.vector_store %arg10[%c0_9, %c0_10, %c0_11], %15 {strides = array<i32>} : memref<4x8x1xf32, #tpu.memory_space<vmem>>, vector<4x8x1xf32>,
      %cst_12 = arith.constant 0.000000e+00 : f32
      %17 = vector.broadcast %cst_12 : f32 to vector<4x8x8xf32>
      %c0_13 = arith.constant 0 : index
      %c0_14 = arith.constant 0 : index
      %c0_15 = arith.constant 0 : index
      %18 = vector.load %arg11[%c0_13, %c0_14, %c0_15] : memref<4x8x8xf32, #tpu.memory_space<vmem>>, vector<4x8x8xf32>
      tpu.vector_store %arg11[%c0_13, %c0_14, %c0_15], %17 {strides = array<i32>} : memref<4x8x8xf32, #tpu.memory_space<vmem>>, vector<4x8x8xf32>,
    } else {
    }
    %c8_i32_2 = arith.constant 8 : i32
    %5 = arith.addi %0, %c8_i32_2 : i32
    %c1_i32 = arith.constant 1 : i32
    %6 = arith.subi %5, %c1_i32 : i32
    %7 = arith.cmpi sle, %1, %6 : i32
    %8 = arith.extui %7 : i1 to i32
    %c0_i32_3 = arith.constant 0 : i32
    %9 = arith.cmpi ne, %8, %c0_i32_3 : i32
    scf.if %9 {
      %c0 = arith.constant 0 : index
      %c0_6 = arith.constant 0 : index
      %c0_7 = arith.constant 0 : index
      %c0_8 = arith.constant 0 : index
      %13 = vector.load %arg3[%c0, %c0_6, %c0_7, %c0_8] : memref<1x4x8x8xf32, #tpu.memory_space<vmem>>, vector<1x4x8x8xf32>
      %14 = vector.shape_cast %13 : vector<1x4x8x8xf32> to vector<4x8x8xf32>
      %c0_9 = arith.constant 0 : index
      %c0_10 = arith.constant 0 : index
      %c0_11 = arith.constant 0 : index
      %c0_12 = arith.constant 0 : index
      %15 = vector.load %arg4[%c0_9, %c0_10, %c0_11, %c0_12] : memref<1x4x8x8xf32, #tpu.memory_space<vmem>>, vector<1x4x8x8xf32>
      %16 = vector.shape_cast %15 : vector<1x4x8x8xf32> to vector<4x8x8xf32>
      %c0_13 = arith.constant 0 : index
      %c0_14 = arith.constant 0 : index
      %c0_15 = arith.constant 0 : index
      %c0_16 = arith.constant 0 : index
      %17 = vector.load %arg5[%c0_13, %c0_14, %c0_15, %c0_16] : memref<1x4x8x8xf32, #tpu.memory_space<vmem>>, vector<1x4x8x8xf32>
      %18 = vector.shape_cast %17 : vector<1x4x8x8xf32> to vector<4x8x8xf32>
      %cst = arith.constant dense<0.000000e+00> : vector<4x8x8xf32>
      %19 = tpu.matmul %14, %16, %cst {dimension_numbers = #tpu.dot_dimension_numbers<[2], [2], [1], [1], [0, 0, 0, 1, 1, 1], [0], [0]>} : vector<4x8x8xf32>, vector<4x8x8xf32>, vector<4x8x8xf32> -> vector<4x8x8xf32>
      %20 = tpu.iota {dimensions = array<i32: 0>} : vector<8x8xi32>
      %21 = vector.broadcast %0 : i32 to vector<8x8xi32>
      %22 = arith.addi %21, %20 : vector<8x8xi32>
      %23 = tpu.iota {dimensions = array<i32: 1>} : vector<8x8xi32>
      %24 = vector.broadcast %1 : i32 to vector<8x8xi32>
      %25 = arith.addi %24, %23 : vector<8x8xi32>
      %26 = arith.cmpi sge, %22, %25 : vector<8x8xi32>
      %27 = vector.shape_cast %26 : vector<8x8xi1> to vector<1x8x8xi1>
      %cst_17 = arith.constant -1.000000e+10 : f32
      %28 = vector.shape_cast %27 : vector<1x8x8xi1> to vector<1x8x8xi1>
      %29 = vector.broadcast %28 : vector<1x8x8xi1> to vector<4x8x8xi1>
      %30 = vector.broadcast %cst_17 : f32 to vector<4x8x8xf32>
      %31 = arith.select %29, %19, %30 : vector<4x8x8xi1>, vector<4x8x8xf32>
      %c0_18 = arith.constant 0 : index
      %c0_19 = arith.constant 0 : index
      %c0_20 = arith.constant 0 : index
      %32 = vector.load %arg9[%c0_18, %c0_19, %c0_20] : memref<4x8x1xf32, #tpu.memory_space<vmem>>, vector<4x8x1xf32>
      %cst_21 = arith.constant dense<0xFF800000> : vector<4x8xf32>
      %33 = vector.multi_reduction <maximumf>, %31, %cst_21 [2] : vector<4x8x8xf32> to vector<4x8xf32>
      %34 = vector.shape_cast %33 : vector<4x8xf32> to vector<4x8x1xf32>
      %35 = arith.maximumf %32, %34 : vector<4x8x1xf32>
      %36 = arith.subf %32, %35 : vector<4x8x1xf32>
      %37 = math.exp %36 : vector<4x8x1xf32>
      %38 = vector.broadcast %35 : vector<4x8x1xf32> to vector<4x8x8xf32>
      %39 = arith.subf %31, %38 : vector<4x8x8xf32>
      %40 = math.exp %39 : vector<4x8x8xf32>
      %c0_22 = arith.constant 0 : index
      %c0_23 = arith.constant 0 : index
      %c0_24 = arith.constant 0 : index
      %41 = vector.load %arg10[%c0_22, %c0_23, %c0_24] : memref<4x8x1xf32, #tpu.memory_space<vmem>>, vector<4x8x1xf32>
      %42 = arith.mulf %37, %41 : vector<4x8x1xf32>
      %cst_25 = arith.constant dense<0.000000e+00> : vector<4x8xf32>
      %43 = vector.multi_reduction <add>, %40, %cst_25 [2] : vector<4x8x8xf32> to vector<4x8xf32>
      %44 = vector.shape_cast %43 : vector<4x8xf32> to vector<4x8x1xf32>
      %45 = arith.addf %42, %44 : vector<4x8x1xf32>
      %c0_26 = arith.constant 0 : index
      %c0_27 = arith.constant 0 : index
      %c0_28 = arith.constant 0 : index
      %46 = vector.load %arg10[%c0_26, %c0_27, %c0_28] : memref<4x8x1xf32, #tpu.memory_space<vmem>>, vector<4x8x1xf32>
      tpu.vector_store %arg10[%c0_26, %c0_27, %c0_28], %45 {strides = array<i32>} : memref<4x8x1xf32, #tpu.memory_space<vmem>>, vector<4x8x1xf32>,
      %c0_29 = arith.constant 0 : index
      %c0_30 = arith.constant 0 : index
      %c0_31 = arith.constant 0 : index
      %47 = vector.load %arg11[%c0_29, %c0_30, %c0_31] : memref<4x8x8xf32, #tpu.memory_space<vmem>>, vector<4x8x8xf32>
      %48 = vector.broadcast %37 : vector<4x8x1xf32> to vector<4x8x8xf32>
      %49 = arith.mulf %48, %47 : vector<4x8x8xf32>
      %cst_32 = arith.constant dense<0.000000e+00> : vector<4x8x8xf32>
      %50 = tpu.matmul %40, %18, %cst_32 {dimension_numbers = #tpu.dot_dimension_numbers<[2], [1], [1], [2], [0, 0, 0, 1, 1, 2], [0], [0]>} : vector<4x8x8xf32>, vector<4x8x8xf32>, vector<4x8x8xf32> -> vector<4x8x8xf32>
      %51 = arith.addf %49, %50 : vector<4x8x8xf32>
      %c0_33 = arith.constant 0 : index
      %c0_34 = arith.constant 0 : index
      %c0_35 = arith.constant 0 : index
      %52 = vector.load %arg11[%c0_33, %c0_34, %c0_35] : memref<4x8x8xf32, #tpu.memory_space<vmem>>, vector<4x8x8xf32>
      tpu.vector_store %arg11[%c0_33, %c0_34, %c0_35], %51 {strides = array<i32>} : memref<4x8x8xf32, #tpu.memory_space<vmem>>, vector<4x8x8xf32>,
      %c0_36 = arith.constant 0 : index
      %c0_37 = arith.constant 0 : index
      %c0_38 = arith.constant 0 : index
      %53 = vector.load %arg9[%c0_36, %c0_37, %c0_38] : memref<4x8x1xf32, #tpu.memory_space<vmem>>, vector<4x8x1xf32>
      tpu.vector_store %arg9[%c0_36, %c0_37, %c0_38], %35 {strides = array<i32>} : memref<4x8x1xf32, #tpu.memory_space<vmem>>, vector<4x8x1xf32>,
    } else {
    }
    %c0_i32_4 = arith.constant 0 : i32
    %10 = arith.cmpi eq, %arg2, %c0_i32_4 : i32
    %11 = arith.extui %10 : i1 to i32
    %c0_i32_5 = arith.constant 0 : i32
    %12 = arith.cmpi ne, %11, %c0_i32_5 : i32
    scf.if %12 {
      %c0 = arith.constant 0 : index
      %c0_6 = arith.constant 0 : index
      %c0_7 = arith.constant 0 : index
      %13 = vector.load %arg10[%c0, %c0_6, %c0_7] : memref<4x8x1xf32, #tpu.memory_space<vmem>>, vector<4x8x1xf32>
      %14 = tpu.reciprocal %13 {approx = true} : vector<4x8x1xf32> -> vector<4x8x1xf32>
      %c0_8 = arith.constant 0 : index
      %c0_9 = arith.constant 0 : index
      %c0_10 = arith.constant 0 : index
      %15 = vector.load %arg11[%c0_8, %c0_9, %c0_10] : memref<4x8x8xf32, #tpu.memory_space<vmem>>, vector<4x8x8xf32>
      %16 = vector.broadcast %14 : vector<4x8x1xf32> to vector<4x8x8xf32>
      %17 = arith.mulf %15, %16 : vector<4x8x8xf32>
      %c0_11 = arith.constant 0 : index
      %c0_12 = arith.constant 0 : index
      %c0_13 = arith.constant 0 : index
      %18 = vector.load %arg6[%c0_11, %c0_12, %c0_13] : memref<4x8x32xf32, #tpu.memory_space<vmem>>, vector<4x8x32xf32>
      %cst = arith.constant dense<0.000000e+00> : vector<4x8x32xf32>
      %19 = tpu.matmul %17, %18, %cst {dimension_numbers = #tpu.dot_dimension_numbers<[2], [1], [1], [2], [0, 0, 0, 1, 1, 2], [0], [0]>} : vector<4x8x8xf32>, vector<4x8x32xf32>, vector<4x8x32xf32> -> vector<4x8x32xf32>
      %cst_14 = arith.constant dense<0.000000e+00> : vector<8x32xf32>
      %20 = vector.multi_reduction <add>, %19, %cst_14 [0] : vector<4x8x32xf32> to vector<8x32xf32>
      %c0_15 = arith.constant 0 : index
      %c0_16 = arith.constant 0 : index
      %21 = vector.load %arg7[%c0_15, %c0_16] : memref<1x32xf32, #tpu.memory_space<vmem>>, vector<1x32xf32>
      %22 = vector.shape_cast %21 : vector<1x32xf32> to vector<32xf32>
      %23 = vector.shape_cast %22 : vector<32xf32> to vector<1x32xf32>
      %24 = vector.broadcast %23 : vector<1x32xf32> to vector<8x32xf32>
      %25 = arith.addf %20, %24 : vector<8x32xf32>
      %c0_17 = arith.constant 0 : index
      %c0_18 = arith.constant 0 : index
      %c0_19 = arith.constant 0 : index
      %26 = vector.load %arg8[%c0_17, %c0_18, %c0_19] : memref<1x8x32xf32, #tpu.memory_space<vmem>>, vector<1x8x32xf32>
      %27 = vector.shape_cast %26 : vector<1x8x32xf32> to vector<8x32xf32>
      %28 = vector.shape_cast %25 : vector<8x32xf32> to vector<1x8x32xf32>
      tpu.vector_store %arg8[%c0_17, %c0_18, %c0_19], %28 {strides = array<i32>} : memref<1x8x32xf32, #tpu.memory_space<vmem>>, vector<1x8x32xf32>,
    } else {
    }
    return
  }
  func.func @transform_0(%arg0: i32, %arg1: i32, %arg2: i32) -> (i32, i32, i32, i32) {
    %c0_i32 = arith.constant 0 : i32
    %c0_i32_0 = arith.constant 0 : i32
    %c0_i32_1 = arith.constant 0 : i32
    return %arg0, %c0_i32, %arg1, %c0_i32_0 : i32, i32, i32, i32
  }
  func.func @transform_1(%arg0: i32, %arg1: i32, %arg2: i32) -> (i32, i32, i32, i32) {
    %c0_i32 = arith.constant 0 : i32
    %c0_i32_0 = arith.constant 0 : i32
    %c0_i32_1 = arith.constant 0 : i32
    return %arg0, %c0_i32, %arg2, %c0_i32_0 : i32, i32, i32, i32
  }
  func.func @transform_2(%arg0: i32, %arg1: i32, %arg2: i32) -> (i32, i32, i32, i32) {
    %c0_i32 = arith.constant 0 : i32
    %c0_i32_0 = arith.constant 0 : i32
    %c0_i32_1 = arith.constant 0 : i32
    return %arg0, %c0_i32, %arg2, %c0_i32_0 : i32, i32, i32, i32
  }
  func.func @transform_3(%arg0: i32, %arg1: i32, %arg2: i32) -> (i32, i32, i32) {
    %c0_i32 = arith.constant 0 : i32
    %c0_i32_0 = arith.constant 0 : i32
    %c0_i32_1 = arith.constant 0 : i32
    %c0_i32_2 = arith.constant 0 : i32
    return %c0_i32, %c0_i32_0, %c0_i32_1 : i32, i32, i32
  }
  func.func @transform_4(%arg0: i32, %arg1: i32, %arg2: i32) -> (i32, i32) {
    %c0_i32 = arith.constant 0 : i32
    %c0_i32_0 = arith.constant 0 : i32
    %c0_i32_1 = arith.constant 0 : i32
    return %c0_i32, %c0_i32_0 : i32, i32
  }
  func.func @transform_5(%arg0: i32, %arg1: i32, %arg2: i32) -> (i32, i32, i32) {
    %c0_i32 = arith.constant 0 : i32
    %c0_i32_0 = arith.constant 0 : i32
    return %arg0, %arg1, %c0_i32 : i32, i32, i32
  }
}

</mosaic_0001>

<bundles_post_ra>
// kernel: multi_head_attention.2
= control target key start
LH: loop header
LB: loop body
LE: loop exit
PB: predicated region body
PF: predicated region fallthrough
CT: control target
= control target key end

     0   :  { %s991_s30 = smov 0   ;;  %s993_s10 = smov 0   ;;  %s1090_s0 = inlined_call_operand.vmem [shape: f32[2,8,32], index: 0, kind: input, shape index: {}]   ;;  %s1091_s1 = inlined_call_operand.vmem [shape: f32[32,32], index: 1, kind: input, shape index: {}]   ;;  %s1092_s2 = inlined_call_operand.vmem [shape: f32[32,32], index: 2, kind: input, shape index: {}]   ;;  %s1093_s3 = inlined_call_operand.vmem [shape: f32[32,32], index: 3, kind: input, shape index: {}]   ;;  %s1094_s4 = inlined_call_operand.vmem [shape: f32[1,32], index: 4, kind: input, shape index: {}]   ;;  %s1095_s5 = inlined_call_operand.vmem [shape: f32[1,32], index: 5, kind: input, shape index: {}]   ;;  %s1096_s6 = inlined_call_operand.vmem [shape: f32[1,32], index: 6, kind: input, shape index: {}]   ;;  %s1097_s7 = inlined_call_operand.vmem [shape: f32[2,8,32], index: 7, kind: output, shape index: {0}]   ;;  %s1098_s8 = inlined_call_operand.vmem [shape: f32[2,8,32], index: 8, kind: output, shape index: {1}]   ;;  %s1099_s9 = inlined_call_operand.vmem [shape: f32[2,8,32], index: 9, kind: output, shape index: {2}]  }
   0x1   :  { %s995_s11 = smov 0  }
   0x2 LB: > { %s32_s12 = sadd.s32 1, %s932_s10  ;;  %p808_p0 = scmp.ge.s32.totalorder %s936_s11, 1  ;;  %s936_s11 = sphi %s995_s11, %s20_s11   ;;  %s932_s10 = sphi %s993_s10, %s1101_s10   ;;  %s928_s30 = sphi %s991_s30, %s1100_s30  }
   0x3   : > { %p34_p1 = scmp.ge.s32.totalorder %s32_s12, 2  ;;  %p314_p2 = scmp.lt.s32.totalorder %s936_s11, 3 }
   0x5   : > { %s1103_s12 = smov (%p34_p1, %s32_s12), 0  ;;  %p315_p3 = pnand %p808_p0, %p314_p2 }
   0x6   : > { %v397_v0 = vld [vmem:[%s1091_s1] sm:$0xff] (!%p315_p3)  ;;  %v398_v1 = vld [vmem:[%s1091_s1 + $0x8] sm:$0xff] (!%p315_p3)  ;;  %v399_v2 = vld [vmem:[%s1091_s1 + $0x10] sm:$0xff] (!%p315_p3)  ;;  %v938_v3 = vmov (!%p315_p3), 0.0|0.0   ;;  %p368_p4 = scmp.lt.s32.totalorder (!%p315_p3), %s928_s30, 1  ;;  %vm939_vm0 = vmmov (!%p315_p3), 0  }
   0x7   : > { %318 = sbr.rel (%p315_p3) target bundleno = 241 (0xf1), region = 48  ;;  %869 = vmatprep.subr.bf16.mxu0 (!%p315_p3), %v938_v3  ;;  %v870_v4 = vpack.c.bf16 (!%p315_p3), %v398_v1, %v397_v0  ;;  %v400_v5 = vld [vmem:[%s1091_s1 + $0x18] sm:$0xff] (!%p315_p3)  ;;  %875 = vmatprep.subr.bf16.mxu1 (!%p315_p3), %v938_v3  ;;  %v482_v6 = vld [vmem:[%s1092_s2] sm:$0xff] (!%p315_p3)  ;;  %v483_v7 = vld [vmem:[%s1092_s2 + $0x8] sm:$0xff] (!%p315_p3)  ;;  %v940_v9 = vmov (!%p315_p3), 0.0   ;;  %vm408_vm1 = vcmask (!%p315_p3), 261120  }
   0x8   : > { %v876_v8 = vpack.c.bf16 (!%p315_p3), %v483_v7, %v482_v6  ;;  %844 = vmatprep.mubr.msk.f32.mxu0 (!%p315_p3), %vm939_vm0, %v940_v9  ;;  %v484_v10 = vld [vmem:[%s1092_s2 + $0x10] sm:$0xff] (!%p315_p3)  ;;  %855 = vmatprep.mubr.msk.f32.mxu1 (!%p315_p3), %vm939_vm0, %v940_v9  ;;  %v873_v11 = vpack.c.bf16 (!%p315_p3), %v400_v5, %v399_v2  ;;  %v485_v12 = vld [vmem:[%s1092_s2 + $0x18] sm:$0xff] (!%p315_p3)  ;;  %v563_v13 = vld [vmem:[%s1093_s3] sm:$0xff] (!%p315_p3) }
   0x9   : > { %871 = vmatpush3.bf16.msra.mxu0 (!%p315_p3), %v870_v4  ;;  %v564_v14 = vld [vmem:[%s1093_s3 + $0x8] sm:$0xff] (!%p315_p3)  ;;  %v879_v15 = vpack.c.bf16 (!%p315_p3), %v485_v12, %v484_v10  ;;  %v565_v18 = vld [vmem:[%s1093_s3 + $0x10] sm:$0xff] (!%p315_p3)  ;;  %v566_v19 = vld [vmem:[%s1093_s3 + $0x18] sm:$0xff] (!%p315_p3) }
   0xa   : > { %872 = vmatprep.subr.bf16.mxu0 (!%p315_p3), %v938_v3  ;;  %877 = vmatpush3.bf16.msra.mxu1 (!%p315_p3), %v876_v8  ;;  %v882_v17 = vpack.c.bf16 (!%p315_p3), %v564_v14, %v563_v13  ;;  %v885_v20 = vpack.c.bf16 (!%p315_p3), %v566_v19, %v565_v18  ;;  %v813_v21 = vld [vmem:[%s1094_s4] ss:$0 sm:$0xff] (!%p315_p3) }
   0xb   : > { %878 = vmatprep.subr.bf16.mxu1 (!%p315_p3), %v938_v3  ;;  %v815_v22 = vld [vmem:[%s1095_s5] ss:$0 sm:$0xff] (!%p315_p3) }
   0xc   : > { %v817_v30 = vld [vmem:[%s1096_s6] ss:$0 sm:$0xff] (!%p315_p3) }
   0xd   : > { %874 = vmatpush3.bf16.msra.mxu0 (!%p315_p3), %v873_v11 }
   0xe   : > { %s1105_s30 = smov (!%p368_p4, %s928_s30), 1  ;;  %881 = vmatprep.subr.bf16.mxu0 %v938_v3  ;;  %880 = vmatpush3.bf16.msra.mxu1 %v879_v15 }
   0xf   : > { %s1041_s16 = sshll.u32 %s1105_s30, 3 }
  0x10   : > { %s374_s19 = scalar_lea.vmem %s1090_s0, %s1041_s16  ;;  %s395_s29 = scalar_lea.vmem %s1099_s9, %s1041_s16 }
  0x11   : > { %v396_v16 = vld [vmem:[%s374_s19] sm:$0xff]  ;;  %s381_s15 = scalar_lea.vmem %s1097_s7, %s1041_s16  ;;  %s388_s21 = scalar_lea.vmem %s1098_s8, %s1041_s16 }
  0x12   : > { %845 = vmatmul.mubr.msk.f32.vlgmr.msra.gmra.mrb[0].mxu0 %vm408_vm1, %v396_v16  ;;  %856 = vmatmul.mubr.msk.f32.vlgmr.msra.gmra.mrb[0].mxu1 %vm408_vm1, %v396_v16 }
  0x13   : > { %883 = vmatpush3.bf16.msra.mxu0 %v882_v17  ;;  %866 = vmatprep.mubr.msk.f32.mxu0 %vm939_vm0, %v940_v9 }
  0x14   : > { %884 = vmatprep.subr.bf16.mxu0 %v938_v3 }
  0x17   : > { %886 = vmatpush3.bf16.msra.mxu0 %v885_v20 }
  0x1a   : > { %867 = vmatmul.mubr.msk.f32.vlgmr.msra.gmra.mrb[2].mxu0 %vm408_vm1, %v396_v16 }
  0xe5   : > { %v478_v23 = vpop.f32.mrb[0].mxu0  ;;  %v559_v26 = vpop.f32.mrb[0].mxu1 }
  0xe6   : > { %v479_v24 = vadd.f32 %v813_v21, %v478_v23  ;;  %v846_v25 = vpop.f32.mrb[1].mxu0  ;;  %v560_v27 = vadd.f32 %v815_v22, %v559_v26  ;;  %v857_v28 = vpop.f32.mrb[1].mxu1 }
  0xe8   : > { %647 = vst.msk [vmem:[%s395_s29] sm:$0xff] %vm408_vm1, %v479_v24  ;;  %v644_v29 = vmul.f32 0.35355338, %v560_v27 }
  0xea   : > { %645 = vst.msk [vmem:[%s381_s15] sm:$0xff] %vm408_vm1, %v644_v29 }
  0xed   : > { %v640_v31 = vpop.f32.mrb[2].mxu0 }
  0xee   : > { %v641_v32 = vadd.f32 %v817_v30, %v640_v31  ;;  %v868_v33 = vpop.f32.mrb[3].mxu0 }
  0xf0   : > { %646 = vst.msk [vmem:[%s388_s21] sm:$0xff] %vm408_vm1, %v641_v32 }
  0xf1 PF: > { %s20_s11 = sadd.s32 1, %s936_s11   ;;  %s1100_s30 = smov %s932_s10 }
  0xf2   : > { %p17_p5 = scmp.ge.s32.totalorder %s20_s11, 4   ;;  %s1101_s10 = smov %s1103_s12 }
  0xf4   :  { %19 = sbr.rel (!%p17_p5) target bundleno = 2 (0x2), region = 102 }

// kernel: multi_head_attention.3
= control target key start
LH: loop header
LB: loop body
LE: loop exit
PB: predicated region body
PF: predicated region fallthrough
CT: control target
= control target key end

     0   :  { %10 = vsyncpa [#allocation6], 0  ;;  %s2164_s0 = inlined_call_operand.vmem [shape: f32[2,4,8,8], index: 0, kind: input, shape index: {}]   ;;  %s2165_s1 = inlined_call_operand.vmem [shape: f32[2,4,8,8], index: 1, kind: input, shape index: {}]   ;;  %s2166_s2 = inlined_call_operand.vmem [shape: f32[2,4,8,8], index: 2, kind: input, shape index: {}]   ;;  %s2167_s3 = inlined_call_operand.vmem [shape: f32[4,8,32], index: 3, kind: input, shape index: {}]   ;;  %s2168_s4 = inlined_call_operand.vmem [shape: f32[1,32], index: 4, kind: input, shape index: {}]   ;;  %s2169_s5 = inlined_call_operand.hbm [shape: f32[2,8,32], index: 5, kind: output, shape index: {}]  }
   0x1   :  { %12 = vsyncpa [#allocation6 + $0x1], 0  ;;  %s1900_s18 = smov 0   ;;  %s1902_s19 = smov 0  }
   0x2   :  { %s1904_s20 = smov 0   ;;  %s1906_s21 = smov 0  }
   0x3   :  { %s1908_s22 = smov 0   ;;  %s1910_s23 = smov 0  }
   0x4 LB: > { %s1580_s24 = sadd.s32 4294967295, %s1863_s23   ;;  %s1581_s25 = sadd.s32 4294967294, %s1863_s23   ;;  %s1863_s23 = sphi %s1910_s23, %s18_s23   ;;  %s1859_s22 = sphi %s1908_s22, %s2176_s22   ;;  %s1855_s21 = sphi %s1906_s21, %s2175_s21   ;;  %s1851_s20 = sphi %s1904_s20, %s2174_s20   ;;  %s1847_s19 = sphi %s1902_s19, %s2173_s19   ;;  %s1843_s18 = sphi %s1900_s18, %s2172_s18  }
   0x5   : > { %s37_s26 = sadd.s32 1, %s1859_s22  ;;  %s172_s27 = sadd.s32 1, %s1851_s20 }
   0x6   : > { %p39_p0 = scmp.ge.s32.totalorder %s37_s26, 2  ;;  %p182_p1 = scmp.ne.s32.totalorder %s1851_s20, %s1847_s19 }
   0x7   : > { %p183_p2 = scmp.eq.s32.totalorder %s1580_s24, 1  ;;  %p188_p3 = scmp.ne.s32.totalorder %s1847_s19, %s1843_s18 }
   0x8   : > { %s2178_s26 = smov (%p39_p0, %s37_s26), 0  ;;  %p189_p5 = scmp.eq.s32.totalorder %s1581_s25, 1 }
   0x9   : > { %p1940_p4 = por %p183_p2, %p182_p1  ;;  %s167_s29 = ssub.s32 %s1859_s22, %s2178_s26 }
   0xa   : > { %p1584_p6 = scmp.ge.s32.totalorder %s1863_s23, 1  ;;  %p170_p7 = scmp.eq.s32.totalorder %s167_s29, 0 }
   0xb   : > { %p1947_p8 = por %p189_p5, %p188_p3  ;;  %p246_p9 = scmp.lt.s32.totalorder %s1863_s23, 3 }
   0xc   : > { %s1953_s6 = scalar_select %p170_p7, %s1851_s20, %s172_s27  }
   0xd   : > { %p247_p10 = pnand %p1584_p6, %p246_p9 }
   0xe   : > { %p293_p11 = scmp.lt.s32.totalorder (!%p247_p10), %s1855_s21, 1  ;;  %vm332_vm0 = vcmask (!%p247_p10), 64512   ;;  %v1865_v0 = vmov (!%p247_p10), 0.0   ;;  %vm1866_vm1 = vmmov (!%p247_p10), 0   ;;  %vm323_vm2 = vcmask (!%p247_p10), 7168   ;;  %s1610_s15 = sshll.u32 (!%p247_p10), %s1855_s21, 7 }
   0xf   : > { %250 = sbr.rel (%p247_p10) target bundleno = 1068 (0x42c), region = 40  ;;  %1640 = vmatprep.subr.mxu0 (!%p247_p10), %v1865_v0  ;;  %333 = vst.msk [vmem:[#allocation4] sm:$0xff] (!%p247_p10), %vm332_vm0, %v1865_v0  ;;  %334 = vst.msk [vmem:[#allocation4 + $0x8] sm:$0xff] (!%p247_p10), %vm332_vm0, %v1865_v0  ;;  %1642 = vmatprep.mubr.msk.f32.mxu0 (!%p247_p10), %vm1866_vm1, %v1865_v0  ;;  %v1867_v9 = vmov (!%p247_p10), -inf   ;;  %v659_v10 = vlaneseq (!%p247_p10)  ;;  %v1868_v29 = vmov (!%p247_p10), 0   ;;  %vm1435_vm4 = vcmask (!%p247_p10), 261120   ;;  %s2116_s27 = scalar_lea.hbm (!%p247_p10), %s2169_s5, %s1610_s15 }
  0x10   : > { %335 = vst.msk [vmem:[#allocation4 + $0x10] sm:$0xff] (!%p247_p10), %vm332_vm0, %v1865_v0  ;;  %336 = vst.msk [vmem:[#allocation4 + $0x18] sm:$0xff] (!%p247_p10), %vm332_vm0, %v1865_v0  ;;  %1645 = vmatprep.subr.mxu1 (!%p247_p10), %v1865_v0  ;;  %1647 = vmatprep.mubr.msk.f32.mxu1 (!%p247_p10), %vm1866_vm1, %v1865_v0 }
  0x11   : > { %324 = vst.msk [vmem:[#allocation2] sm:$0xff] (!%p247_p10), %vm323_vm2, %v1867_v9  ;;  %325 = vst.msk [vmem:[#allocation2 + $0x8] sm:$0xff] (!%p247_p10), %vm323_vm2, %v1867_v9  ;;  %v660_v11 = vshrl.u32 (!%p247_p10), %v659_v10, 7  ;;  %v664_v12 = vand.u32 (!%p247_p10), 127, %v659_v10  ;;  %1759 = vset.pattern.permute.xlu0 (!%p247_p10), %v1868_v29  ;;  %1760 = vset.pattern.permute.xlu1 (!%p247_p10), %v1868_v29 }
  0x12   : > { %326 = vst.msk [vmem:[#allocation2 + $0x10] sm:$0xff] (!%p247_p10), %vm323_vm2, %v1867_v9  ;;  %327 = vst.msk [vmem:[#allocation2 + $0x18] sm:$0xff] (!%p247_p10), %vm323_vm2, %v1867_v9 }
  0x13   : > { %328 = vst.msk [vmem:[#allocation3] sm:$0xff] (!%p247_p10), %vm323_vm2, %v1865_v0  ;;  %329 = vst.msk [vmem:[#allocation3 + $0x8] sm:$0xff] (!%p247_p10), %vm323_vm2, %v1865_v0  ;;  %vm667_vm3 = vcmp.ge.s32.totalorder (!%p247_p10), %v660_v11, %v664_v12 }
  0x14   : > { %330 = vst.msk [vmem:[#allocation3 + $0x10] sm:$0xff] (!%p247_p10), %vm323_vm2, %v1865_v0  ;;  %331 = vst.msk [vmem:[#allocation3 + $0x18] sm:$0xff] (!%p247_p10), %vm323_vm2, %v1865_v0 }
  0x16   : > { %s294_s7 = scalar_select %p293_p11, %s1855_s21, 1 }
  0x17   : > { %s1869_s21 = smov [#allocation5]  }
  0x18   : > { %s1971_s8 = sshll.u32 %s294_s7, 5  ;;  %v2017_v30 = vld [vmem:[#allocation2] sm:$0xff]  ;;  %v2022_v33 = vld [vmem:[#allocation2 + $0x8] sm:$0xff] }
  0x19   : > { %s308_s11 = scalar_lea.vmem %s2165_s1, %s1971_s8  ;;  %s300_s14 = scalar_lea.vmem %s2164_s0, %s1971_s8  ;;  %v2024_v34 = vld [vmem:[#allocation2 + $0x10] sm:$0xff]  ;;  %v2035_v40 = vld [vmem:[#allocation2 + $0x18] sm:$0xff] }
  0x1a   : > { %v346_v1 = vld [vmem:[%s308_s11] sm:$0xff]  ;;  %v347_v2 = vld [vmem:[%s308_s11 + $0x8] sm:$0xff]  ;;  %v348_v5 = vld [vmem:[%s308_s11 + $0x10] sm:$0xff]  ;;  %s316_s17 = scalar_lea.vmem %s2166_s2, %s1971_s8  ;;  %s1789_s8 = sshll.u32 %s1869_s21, 4  ;;  %s1790_s8 = int_to_ptr.vmem [resolvable:$false] %s1789_s8 }
  0x1b   : > { %1641 = vmatpush3.xpose.msk.msra.mxu0 %vm332_vm0, %v346_v1  ;;  %v342_v3 = vld [vmem:[%s300_s14] sm:$0xff]  ;;  %1646 = vmatpush3.xpose.msk.msra.mxu1 %vm332_vm0, %v347_v2  ;;  %v343_v4 = vld [vmem:[%s300_s14 + $0x8] sm:$0xff]  ;;  %v349_v6 = vld [vmem:[%s308_s11 + $0x18] sm:$0xff]  ;;  %s290_s11 = sand.u32 1, %s1847_s19   ;;  %s1791_s9 = scalar_lea.vmem %s1790_s8, 256 }
  0x1c   : > { %1650 = vmatprep.subr.mxu0 %v1865_v0  ;;  %1655 = vmatprep.subr.mxu1 %v1865_v0  ;;  %v344_v7 = vld [vmem:[%s300_s14 + $0x10] sm:$0xff]  ;;  %v345_v8 = vld [vmem:[%s300_s14 + $0x18] sm:$0xff]  ;;  %v350_v46 = vld [vmem:[%s316_s17] sm:$0xff]  ;;  %s1585_s12 = sshll.u32 %s290_s11, 3  ;;  %s1453_s29 = scalar_lea.sflag [#allocation6], %s290_s11 }
  0x1d   : > { %v351_v47 = vld [vmem:[%s316_s17 + $0x8] sm:$0xff]  ;;  %v352_v59 = vld [vmem:[%s316_s17 + $0x10] sm:$0xff]  ;;  %v353_v63 = vld [vmem:[%s316_s17 + $0x18] sm:$0xff]  ;;  %s292_s16 = scalar_lea.vmem [#allocation5], %s1585_s12 }
  0x1e   : > { %1643 = vmatmul.mubr.msk.f32.vlgmr.msra.gmra.mrb[0].mxu0 %vm332_vm0, %v342_v3  ;;  %1648 = vmatmul.mubr.msk.f32.vlgmr.msra.gmra.mrb[0].mxu1 %vm332_vm0, %v343_v4  ;;  %s1467_s17 = sshll.u32 %s292_s16, 4  ;;  %s2118_s17 = int_to_ptr.vmem [resolvable:$true] %s1467_s17 }
  0x1f   : > { %1651 = vmatpush3.xpose.msk.msra.mxu0 %vm332_vm0, %v348_v5  ;;  %1652 = vmatprep.mubr.msk.f32.mxu0 %vm1866_vm1, %v1865_v0  ;;  %s1785_s7 = scalar_lea.vmem %s2118_s17, 128  ;;  %p1792_p1 = scmp.lt.s32.totalorder %s2118_s17, %s1790_s8 }
  0x20   : > { %1656 = vmatpush3.xpose.msk.msra.mxu1 %vm332_vm0, %v349_v6  ;;  %1657 = vmatprep.mubr.msk.f32.mxu1 %vm1866_vm1, %v1865_v0  ;;  %p1786_p12 = scmp.ne.s32.totalorder %s2118_s17, %s1785_s7  ;;  %p1793_p2 = scmp.lt.s32.totalorder %s1791_s9, %s1785_s7 }
  0x21   : > { %1660 = vmatprep.subr.mxu0 %v1865_v0  ;;  %1665 = vmatprep.subr.mxu1 %v1865_v0 }
  0x22   : > { %1653 = vmatmul.mubr.msk.f32.vlgmr.msra.gmra.mrb[2].mxu0 %vm332_vm0, %v344_v7  ;;  %p1787_p13 = pnand %p1786_p12, %p1940_p4  ;;  %p1794_p3 = por %p1793_p2, %p1792_p1 }
  0x23   : > { %1658 = vmatmul.mubr.msk.f32.vlgmr.msra.gmra.mrb[2].mxu1 %vm332_vm0, %v345_v8  ;;  %1662 = vmatprep.mubr.msk.f32.mxu0 %vm1866_vm1, %v1865_v0 }
  0x24   : > { %1667 = vmatprep.mubr.msk.f32.mxu1 %vm1866_vm1, %v1865_v0  ;;  %1661 = vmatpush3.msra.mxu0 %v350_v46  ;;  %p1788_p0 = pneg %p1787_p13 }
  0x25   : > { %1670 = vmatprep.subr.mxu0 %v1865_v0  ;;  %1666 = vmatpush3.msra.mxu1 %v351_v47 }
  0x26   : > { %1675 = vmatprep.subr.mxu1 %v1865_v0  ;;  %p1795_p5 = pnand %p1794_p3, %p1788_p0 }
  0xf1   : > { %v427_v13 = vpop.f32.mrb[0].mxu0  ;;  %v503_v14 = vpop.f32.mrb[0].mxu1 }
  0xf2   : > { %v670_v15 = vsel %vm667_vm3, %v427_v13, -1e+10  ;;  %v1644_v16 = vpop.f32.mrb[1].mxu0  ;;  %v671_v17 = vsel %vm667_vm3, %v503_v14, -1e+10  ;;  %v1649_v18 = vpop.f32.mrb[1].mxu1 }
  0xf3   : > { %v678_v19 = vsel %vm332_vm0, %v670_v15, -inf  ;;  %v681_v20 = vsel %vm332_vm0, %v671_v17, -inf  ;;  %v739_v18 = vld [vmem:[#allocation3 + $0x8] sm:$0xff] }
  0xf4   : > { %679 = vmax.xlane.f32.xlu0 %v678_v19 }
  0xf5   : > { %v579_v21 = vpop.f32.mrb[2].mxu0 }
  0xf6   : > { %v672_v22 = vsel %vm667_vm3, %v579_v21, -1e+10  ;;  %v1654_v23 = vpop.f32.mrb[3].mxu0  ;;  %v655_v24 = vpop.f32.mrb[2].mxu1 }
  0xf7   : > { %v673_v25 = vsel %vm667_vm3, %v655_v24, -1e+10  ;;  %v684_v26 = vsel %vm332_vm0, %v672_v22, -inf  ;;  %v1659_v27 = vpop.f32.mrb[3].mxu1 }
  0xf8   : > { %682 = vmax.xlane.f32.xlu0 %v681_v20  ;;  %685 = vmax.xlane.f32.xlu1 %v684_v26  ;;  %v687_v28 = vsel %vm332_vm0, %v673_v25, -inf  ;;  %v741_v26 = vld [vmem:[#allocation3 + $0x18] sm:$0xff] }
  0xfc   : > { %688 = vmax.xlane.f32.xlu1 %v687_v28 }
 0x181   : > { %v680_v31 = vpop.xlane.xlu0 %679 }
 0x182   : > { %v2020_v32 = vmax.f32 %v2017_v30, %v680_v31 }
 0x184   : > { %v694_v35 = vsub.f32 %v2017_v30, %v2020_v32  ;;  %1095 = vst.msk [vmem:[#allocation2] sm:$0xff] %vm323_vm2, %v2020_v32  ;;  %708 = vperm.xlu0 %1759, %v2020_v32  }
 0x185   : > { %v683_v36 = vpop.xlane.xlu0 %682  ;;  %v686_v37 = vpop.xlane.xlu1 %685 }
 0x186   : > { %v691_v38 = vmax.f32 %v2022_v33, %v683_v36  ;;  %v2033_v39 = vmax.f32 %v2024_v34, %v686_v37  ;;  %v698_v8 = vmul.f32 1.442695, %v694_v35  ;;  %v1138_v36 = vld [vmem:[%s2167_s3] sm:$0xff] }
 0x188   : > { %v695_v41 = vsub.f32 %v2022_v33, %v691_v38  ;;  %1096 = vst.msk [vmem:[#allocation2 + $0x8] sm:$0xff] %vm323_vm2, %v691_v38  ;;  %713 = vperm.xlu1 %1760, %v691_v38   ;;  %v696_v42 = vsub.f32 %v2024_v34, %v2033_v39  ;;  %1097 = vst.msk [vmem:[#allocation2 + $0x10] sm:$0xff] %vm323_vm2, %v2033_v39  ;;  %v1139_v38 = vld [vmem:[%s2167_s3 + $0x8] sm:$0xff] }
 0x189   : > { %v689_v43 = vpop.xlane.xlu1 %688 }
 0x18a   : > { %v693_v44 = vmax.f32 %v2035_v40, %v689_v43  ;;  %v700_v6 = vmul.f32 1.442695, %v695_v41  ;;  %v702_v9 = vmul.f32 1.442695, %v696_v42  ;;  %v767_v41 = vld [vmem:[#allocation4] sm:$0xff] }
 0x18c   : > { %718 = vperm.xlu1 %1760, %v2033_v39   ;;  %v697_v45 = vsub.f32 %v2035_v40, %v693_v44  ;;  %1098 = vst.msk [vmem:[#allocation2 + $0x18] sm:$0xff] %vm323_vm2, %v693_v44 }
 0x18e   : > { %v704_v10 = vmul.f32 1.442695, %v697_v45 }
 0x190   : > { %723 = vperm.xlu1 %1760, %v693_v44   ;;  %v768_v44 = vld [vmem:[#allocation4 + $0x8] sm:$0xff] }
 0x203   : > { %v709_v48 = vpop.permute.xlu0 %708 }
 0x204   : > { %v726_v49 = vsub.f32 %v670_v15, %v709_v48  ;;  %v738_v15 = vld [vmem:[#allocation3] sm:$0xff] }
 0x206   : > { %v730_v50 = vmul.f32 1.442695, %v726_v49 }
 0x207   : > { %v714_v51 = vpop.permute.xlu1 %713 }
 0x208   : > { %1761 = vpow2.f32 %v730_v50  ;;  %v727_v52 = vsub.f32 %v671_v17, %v714_v51  ;;  %v769_v51 = vld [vmem:[#allocation4 + $0x10] sm:$0xff] }
 0x20a   : > { %v732_v53 = vmul.f32 1.442695, %v727_v52 }
 0x20b   : > { %v719_v54 = vpop.permute.xlu1 %718 }
 0x20c   : > { %1763 = vpow2.f32 %v732_v53  ;;  %v728_v55 = vsub.f32 %v672_v22, %v719_v54  ;;  %v740_v22 = vld [vmem:[#allocation3 + $0x10] sm:$0xff] }
 0x20e   : > { %v734_v56 = vmul.f32 1.442695, %v728_v55 }
 0x20f   : > { %v724_v57 = vpop.permute.xlu1 %723 }
 0x210   : > { %1765 = vpow2.f32 %v734_v56  ;;  %v729_v58 = vsub.f32 %v673_v25, %v724_v57  ;;  %v770_v56 = vld [vmem:[#allocation4 + $0x18] sm:$0xff] }
 0x212   : > { %v1762_v60 = vpop.eup %1761  ;;  %v736_v61 = vmul.f32 1.442695, %v729_v58 }
 0x213   : > { %1663 = vmatmul.mubr.msk.f32.vlgmr.msra.gmra.mrb[4].mxu0 %vm332_vm0, %v1762_v60  ;;  %v746_v62 = vsel %vm332_vm0, %v1762_v60, 0.0 }
 0x214   : > { %1767 = vpow2.f32 %v736_v61  ;;  %747 = vadd.xlane.f32.xlu1 %v746_v62  ;;  %1671 = vmatpush3.msra.mxu0 %v352_v59 }
 0x215   : > { %1672 = vmatprep.mubr.msk.f32.mxu0 %vm1866_vm1, %v1865_v0  ;;  %1680 = vmatprep.subr.mxu0 %v1865_v0  ;;  %1769 = vpow2.f32 %v700_v6 }
 0x216   : > { %v1764_v1 = vpop.eup %1763  ;;  %1771 = vpow2.f32 %v698_v8 }
 0x217   : > { %1668 = vmatmul.mubr.msk.f32.vlgmr.msra.gmra.mrb[4].mxu1 %vm332_vm0, %v1764_v1  ;;  %v749_v2 = vsel %vm332_vm0, %v1764_v1, 0.0  ;;  %1773 = vpow2.f32 %v702_v9  ;;  %v1141_v9 = vld [vmem:[%s2167_s3 + $0x18] sm:$0xff] }
 0x218   : > { %750 = vadd.xlane.f32.xlu0 %v749_v2  ;;  %1676 = vmatpush3.msra.mxu1 %v353_v63  ;;  %1775 = vpow2.f32 %v704_v10 }
 0x219   : > { %1677 = vmatprep.mubr.msk.f32.mxu1 %vm1866_vm1, %v1865_v0  ;;  %1685 = vmatprep.subr.mxu1 %v1865_v0 }
 0x21a   : > { %v1766_v3 = vpop.eup %1765 }
 0x21b   : > { %1673 = vmatmul.mubr.msk.f32.vlgmr.msra.gmra.mrb[6].mxu0 %vm332_vm0, %v1766_v3  ;;  %v752_v4 = vsel %vm332_vm0, %v1766_v3, 0.0 }
 0x21c   : > { %753 = vadd.xlane.f32.xlu1 %v752_v4  ;;  %1682 = vmatprep.mubr.msk.f32.mxu0 %vm1866_vm1, %v1865_v0 }
 0x21d   : > { %1681 = vmatpush3.msra.mxu0 %v1138_v36 }
 0x21e   : > { %v1768_v5 = vpop.eup %1767  ;;  %1690 = vmatprep.subr.mxu0 %v1865_v0 }
 0x21f   : > { %1678 = vmatmul.mubr.msk.f32.vlgmr.msra.gmra.mrb[6].mxu1 %vm332_vm0, %v1768_v5  ;;  %v755_v7 = vsel %vm332_vm0, %v1768_v5, 0.0  ;;  %v1770_v11 = vpop.eup %1769  ;;  %v1140_v5 = vld [vmem:[%s2167_s3 + $0x10] sm:$0xff] }
 0x220   : > { %756 = vadd.xlane.f32.xlu1 %v755_v7  ;;  %1687 = vmatprep.mubr.msk.f32.mxu1 %vm1866_vm1, %v1865_v0  ;;  %v1772_v12 = vpop.eup %1771  ;;  %v743_v20 = vmul.f32 %v1770_v11, %v739_v18 }
 0x221   : > { %v1774_v13 = vpop.eup %1773  ;;  %v742_v16 = vmul.f32 %v1772_v12, %v738_v15  ;;  %1686 = vmatpush3.msra.mxu1 %v1139_v38 }
 0x222   : > { %v1776_v14 = vpop.eup %1775  ;;  %v744_v24 = vmul.f32 %v1774_v13, %v740_v22  ;;  %1695 = vmatprep.subr.mxu1 %v1865_v0 }
 0x223   : > { %v745_v29 = vmul.f32 %v1776_v14, %v741_v26 }
 0x22e   : > { %778 = vperm.xlu0 %1759, %v1770_v11  }
 0x231   : > { %773 = vperm.xlu1 %1760, %v1772_v12  }
 0x235   : > { %783 = vperm.xlu1 %1760, %v1774_v13  }
 0x239   : > { %788 = vperm.xlu1 %1760, %v1776_v14  }
 0x2a1   : > { %v748_v17 = vpop.xlane.xlu1 %747 }
 0x2a2   : > { %v758_v19 = vadd.f32 %v748_v17, %v742_v16 }
 0x2a4   : > { %763 = vst.msk [vmem:[#allocation3] sm:$0xff] %vm323_vm2, %v758_v19 }
 0x2a5   : > { %v751_v21 = vpop.xlane.xlu0 %750 }
 0x2a6   : > { %v759_v23 = vadd.f32 %v751_v21, %v743_v20 }
 0x2a8   : > { %764 = vst.msk [vmem:[#allocation3 + $0x8] sm:$0xff] %vm323_vm2, %v759_v23 }
 0x2a9   : > { %v754_v25 = vpop.xlane.xlu1 %753 }
 0x2aa   : > { %v760_v27 = vadd.f32 %v754_v25, %v744_v24 }
 0x2ab   : > { %v1102_v28 = vld [vmem:[#allocation3] sm:$0xff] }
 0x2ac   : > { %765 = vst.msk [vmem:[#allocation3 + $0x10] sm:$0xff] %vm323_vm2, %v760_v27  ;;  %1777 = vrcp.f32 %v1102_v28  ;;  %v1608_v28 = vld [vmem:[%s2168_s4] ss:$0 sm:$0xff] }
 0x2ad   : > { %v757_v30 = vpop.xlane.xlu1 %756  ;;  %v779_v45 = vpop.permute.xlu0 %778 }
 0x2ae   : > { %v761_v31 = vadd.f32 %v757_v30, %v745_v29  ;;  %v792_v50 = vmul.f32 %v779_v45, %v768_v44 }
 0x2af   : > { %v1103_v32 = vld [vmem:[#allocation3 + $0x8] sm:$0xff] }
 0x2b0   : > { %766 = vst.msk [vmem:[#allocation3 + $0x18] sm:$0xff] %vm323_vm2, %v761_v31  ;;  %1779 = vrcp.f32 %v1103_v32 }
 0x2b1   : > { %v774_v42 = vpop.permute.xlu1 %773 }
 0x2b2   : > { %v791_v43 = vmul.f32 %v774_v42, %v767_v41 }
 0x2b3   : > { %v1104_v33 = vld [vmem:[#allocation3 + $0x10] sm:$0xff] }
 0x2b4   : > { %1781 = vrcp.f32 %v1104_v33 }
 0x2b5   : > { %v784_v49 = vpop.permute.xlu1 %783 }
 0x2b6   : > { %v1778_v34 = vpop.eup %1777  ;;  %v793_v55 = vmul.f32 %v784_v49, %v769_v51 }
 0x2b7   : > { %1116 = vperm.xlu1 %1760, %v1778_v34   ;;  %v1105_v35 = vld [vmem:[#allocation3 + $0x18] sm:$0xff] }
 0x2b8   : > { %1783 = vrcp.f32 %v1105_v35 }
 0x2b9   : > { %v789_v57 = vpop.permute.xlu1 %788 }
 0x2ba   : > { %v1780_v37 = vpop.eup %1779  ;;  %v794_v61 = vmul.f32 %v789_v57, %v770_v56 }
 0x2bb   : > { %1121 = vperm.xlu0 %1759, %v1780_v37  }
 0x2be   : > { %v1782_v39 = vpop.eup %1781 }
 0x2bf   : > { %1126 = vperm.xlu1 %1760, %v1782_v39  }
 0x2c2   : > { %v1784_v40 = vpop.eup %1783 }
 0x2c3   : > { %1131 = vperm.xlu0 %1759, %v1784_v40  }
 0x2e6   : > { %v864_v46 = vpop.f32.mrb[4].mxu0 }
 0x2e7   : > { %v1087_v47 = vadd.f32 %v864_v46, %v791_v43  ;;  %v1664_v48 = vpop.f32.mrb[5].mxu0 }
 0x2e9   : > { %1091 = vst.msk [vmem:[#allocation4] sm:$0xff] %vm332_vm0, %v1087_v47 }
 0x2ea   : > { %v937_v52 = vpop.f32.mrb[4].mxu1 }
 0x2eb   : > { %v1088_v53 = vadd.f32 %v937_v52, %v792_v50  ;;  %v1669_v54 = vpop.f32.mrb[5].mxu1 }
 0x2ed   : > { %1092 = vst.msk [vmem:[#allocation4 + $0x8] sm:$0xff] %vm332_vm0, %v1088_v53 }
 0x2ee   : > { %v1010_v58 = vpop.f32.mrb[6].mxu0 }
 0x2ef   : > { %v1089_v59 = vadd.f32 %v1010_v58, %v793_v55  ;;  %v1674_v60 = vpop.f32.mrb[7].mxu0 }
 0x2f0   : > { %v1110_v3 = vld [vmem:[#allocation4] sm:$0xff] }
 0x2f1   : > { %1093 = vst.msk [vmem:[#allocation4 + $0x10] sm:$0xff] %vm332_vm0, %v1089_v59 }
 0x2f2   : > { %v1083_v62 = vpop.f32.mrb[6].mxu1 }
 0x2f3   : > { %v1090_v63 = vadd.f32 %v1083_v62, %v794_v61  ;;  %v1679_v1 = vpop.f32.mrb[7].mxu1 }
 0x2f4   : > { %v1111_v6 = vld [vmem:[#allocation4 + $0x8] sm:$0xff] }
 0x2f5   : > { %1094 = vst.msk [vmem:[#allocation4 + $0x18] sm:$0xff] %vm332_vm0, %v1090_v63 }
 0x2f8   : > { %v1112_v11 = vld [vmem:[#allocation4 + $0x10] sm:$0xff] }
 0x2fc   : > { %v1113_v14 = vld [vmem:[#allocation4 + $0x18] sm:$0xff] }
 0x336   : > { %v1117_v2 = vpop.permute.xlu1 %1116 }
 0x337   : > { %v1134_v4 = vmul.f32 %v1117_v2, %v1110_v3 }
 0x339   : > { %1683 = vmatmul.mubr.msk.f32.vlgmr.msra.gmra.mrb[8].mxu0 %vm332_vm0, %v1134_v4 }
 0x33a   : > { %v1122_v7 = vpop.permute.xlu0 %1121  ;;  %1691 = vmatpush3.msra.mxu0 %v1140_v5  ;;  %1692 = vmatprep.mubr.msk.f32.mxu0 %vm1866_vm1, %v1865_v0 }
 0x33b   : > { %v1135_v8 = vmul.f32 %v1122_v7, %v1111_v6 }
 0x33d   : > { %1688 = vmatmul.mubr.msk.f32.vlgmr.msra.gmra.mrb[8].mxu1 %vm332_vm0, %v1135_v8 }
 0x33e   : > { %v1127_v10 = vpop.permute.xlu1 %1126  ;;  %1696 = vmatpush3.msra.mxu1 %v1141_v9  ;;  %1697 = vmatprep.mubr.msk.f32.mxu1 %vm1866_vm1, %v1865_v0 }
 0x33f   : > { %v1136_v12 = vmul.f32 %v1127_v10, %v1112_v11 }
 0x341   : > { %1693 = vmatmul.mubr.msk.f32.vlgmr.msra.gmra.mrb[10].mxu0 %vm332_vm0, %v1136_v12 }
 0x342   : > { %v1132_v13 = vpop.permute.xlu0 %1131 }
 0x343   : > { %v1137_v15 = vmul.f32 %v1132_v13, %v1113_v14 }
 0x345   : > { %1698 = vmatmul.mubr.msk.f32.vlgmr.msra.gmra.mrb[10].mxu1 %vm332_vm0, %v1137_v15 }
 0x40c   : > { %v1212_v16 = vpop.f32.mrb[8].mxu0 }
 0x40d   : > { %v1684_v17 = vpop.f32.mrb[9].mxu0  ;;  %v1436_v19 = vsel %vm1435_vm4, %v1212_v16, 0.0 }
 0x410   : > { %v1285_v18 = vpop.f32.mrb[8].mxu1 }
 0x411   : > { %v1437_v20 = vsel %vm1435_vm4, %v1285_v18, 0.0  ;;  %v1689_v21 = vpop.f32.mrb[9].mxu1 }
 0x412   : > { %v1438_v0 = vadd.f32 %v1437_v20, %v1436_v19 }
 0x414   : > { %v1358_v22 = vpop.f32.mrb[10].mxu0 }
 0x415   : > { %v1439_v23 = vsel %vm1435_vm4, %v1358_v22, 0.0  ;;  %v1694_v24 = vpop.f32.mrb[11].mxu0 }
 0x416   : > { %v1440_v25 = vadd.f32 %v1439_v23, %v1438_v0 }
 0x418   : > { %v1431_v26 = vpop.f32.mrb[10].mxu1 }
 0x419   : > { %v1441_v27 = vsel %vm1435_vm4, %v1431_v26, 0.0  ;;  %v1699_v29 = vpop.f32.mrb[11].mxu1 }
 0x41a   : > { %v1442_v30 = vadd.f32 %v1441_v27, %v1440_v25 }
 0x41c   : > { %v1450_v31 = vadd.f32 %v1608_v28, %v1442_v30 }
 0x41e   : > { %1451 = vst.msk [vmem:[%s292_s16] sm:$0xff] %vm1435_vm4, %v1450_v31 }
 0x41f   : > { %1798 = shalt.err (!%p1795_p5)
}
 0x420   : > { %s1799_s10 = scalar_lea.hbm %s2116_s27, 128  ;;  %s1803_s13 = scalar_lea.hbm %s2169_s5, 256 }
 0x421   : > { %p1800_p6 = scmp.ne.s32.totalorder %s2116_s27, %s1799_s10  ;;  %p1804_p10 = scmp.lt.u32.totalorder %s2116_s27, %s2169_s5 }
 0x422   : > { %p1805_p11 = scmp.lt.u32.totalorder %s1803_s13, %s1799_s10  ;;  %p1807_p13 = scmp.lt.u32.totalorder %s1799_s10, %s2116_s27 }
 0x423   : > { %p1801_p7 = pnand %p1800_p6, %p1940_p4 }
 0x424   : > { %p1806_p12 = por %p1805_p11, %p1804_p10 }
 0x425   : > { %p1802_p9 = pneg %p1801_p7 }
 0x426   : > { %p1808_p0 = por %p1807_p13, %p1806_p12 }
 0x428   : > { %p1809_p1 = pnand %p1808_p0, %p1802_p9 }
 0x42a   : > { %1812 = shalt.err (!%p1809_p1)
}
 0x42b   : > { %1700 = dma.vmem_to_hbm [thread:$0]  (%p1940_p4), %s2118_s17, 128, %s2116_s27, %s1453_s29  }
 0x42c PF: > { %p1706_p2 = scmp.ge.s32.totalorder %s1863_s23, 2  ;;  %s1479_s16 = sand.u32 1, %s1843_s18  }
 0x42d   : > { %s1480_s24 = scalar_lea.sflag [#allocation6], %s1479_s16 }
 0x42e   : > { %p1703_p3 = pnand %p1706_p2, %p1947_p8 }
 0x430   : > { %1838 = dma.done.wait (!%p1703_p3), %s1480_s24, 128  }
 0x431   : > { %1840 = vsyncadd (!%p1703_p3), %s1480_s24, 4294967168  ;;  %s18_s23 = sadd.s32 1, %s1863_s23   ;;  %s2172_s18 = smov %s1847_s19 }
 0x432   : > { %p15_p5 = scmp.ge.s32.totalorder %s18_s23, 4   ;;  %s2173_s19 = smov %s1851_s20 }
 0x433   : > { %s2174_s20 = smov %s1953_s6  ;;  %s2175_s21 = smov %s1859_s22 }
 0x434   : > { %s2176_s22 = smov %s2178_s26  ;;  %17 = sbr.rel (!%p15_p5) target bundleno = 4 (0x4), region = 93 }
 0x43b   :  { %1485 = vsyncpa [#allocation6], 1 }
 0x43c   :  { %1487 = vsyncpa [#allocation6 + $0x1], 1 }

</bundles_post_ra>
